<compile_context>
chip_gen: v5e
topology: v5e:2x2
jax: 0.10.0
libtpu: 0.0.40
codegen_flags: <defaults>
</compile_context>

<pallas_src>
import math
import functools

import jax
import jax.numpy as jnp
from jax.experimental import pallas as pl
from jax.experimental.pallas import tpu as pltpu


_MIB = 1024 * 1024


# ----------------------------------------------------------------------------
# helpers
# ----------------------------------------------------------------------------

def _maybe_vmem_limit(est_bytes):
    """Raise the scoped-VMEM limit only when the working set needs it.  Capped
    at 48 MiB so it stays comfortably inside v7x's 64 MiB physical VMEM."""
    if est_bytes <= 14 * _MIB:
        return None
    return int(min(max(est_bytes + 4 * _MIB, 32 * _MIB), 48 * _MIB))


def _pick_head_group(heads, dim_head):
    """Heads processed per attention grid step.  Prefer a group whose
    G*dim_head is a multiple of 128 (lane-dense blocks -> packed-buffer
    consumption) and >= 256 (MXU fill on v6e/v7x); fall back to all heads
    (block last dim == full channel dim, always legal)."""
    cands = [g for g in range(1, heads + 1)
             if heads % g == 0 and (g * dim_head) % 128 == 0]
    if not cands:
        return heads
    for g in cands:
        if g * dim_head >= 256:
            return g
    return cands[-1]


# ----------------------------------------------------------------------------
# Tiled linear kernels: o = x @ w_t (+ b), w_t pre-transposed (Cin, Cout) bf16
# ----------------------------------------------------------------------------

def _linear_kernel(x_ref, w_ref, o_ref):
    # Cast the activation tile to the (bf16) weight dtype on the fly: the MXU
    # then runs at bf16 rate; the f32 input is only ever read once from HBM.
    o_ref[...] = jnp.dot(x_ref[...].astype(w_ref.dtype), w_ref[...],
                         preferred_element_type=jnp.float32).astype(o_ref.dtype)


def _linear_bias_kernel(x_ref, w_ref, b_ref, o_ref):
    acc = jnp.dot(x_ref[...].astype(w_ref.dtype), w_ref[...],
                  preferred_element_type=jnp.float32)
    o_ref[...] = (acc + b_ref[...].astype(jnp.float32)).astype(o_ref.dtype)


def linear(x2d, w_t, b=None, *, out_dtype=None, tm_target=512, tn_target=512):
    """x2d: (M, Cin); w_t: (Cin, Cout); optional b: (Cout,).

    One full-Cin contraction tile per grid step -> no K axis, no HBM padding,
    no output slicing.  Partial M / Cout boundary tiles are handled by Pallas's
    masked boundary blocks (rows / columns are independent in a GEMM, so the
    undefined padded region never reaches a valid output element)."""
    M, Cin = x2d.shape
    Cin_w, Cout = w_t.shape
    assert Cin == Cin_w
    out_dtype = w_t.dtype if out_dtype is None else out_dtype
    out_isz = jnp.dtype(out_dtype).itemsize

    tm = M if M <= tm_target else tm_target        # tm_target is 16-aligned
    tn = Cout if Cout <= tn_target else tn_target  # tn_target is 128-aligned

    def ws(tm_, tn_):   # double-buffered VMEM working set estimate
        bias_b = 2 * tn_ * 4 if b is not None else 0
        return 2 * (tm_ * Cin * x2d.dtype.itemsize
                    + Cin * tn_ * w_t.dtype.itemsize
                    + tm_ * tn_ * out_isz) + bias_b

    # Only relevant for unusually large Cin: shrink tm (the activation tile).
    while ws(tm, tn) > 24 * _MIB and tm > 128:
        tm = max(128, ((tm // 2) + 15) // 16 * 16)

    grid = (pl.cdiv(M, tm), pl.cdiv(Cout, tn))
    cost = pl.CostEstimate(
        flops=int(2 * M * Cin * Cout), transcendentals=0,
        bytes_accessed=int(M * Cin * x2d.dtype.itemsize
                           + grid[0] * Cin * Cout * w_t.dtype.itemsize
                           + M * Cout * out_isz))

    x_spec = pl.BlockSpec((tm, Cin), lambda i, j: (i, 0))
    w_spec = pl.BlockSpec((Cin, tn), lambda i, j: (0, j))
    o_spec = pl.BlockSpec((tm, tn), lambda i, j: (i, j))
    cparams = pltpu.CompilerParams(
        dimension_semantics=("parallel", "parallel"),
        vmem_limit_bytes=_maybe_vmem_limit(ws(tm, tn)))
    out_shape = jax.ShapeDtypeStruct((M, Cout), out_dtype)

    if b is None:
        return pl.pallas_call(
            _linear_kernel, out_shape=out_shape,
            grid_spec=pltpu.PrefetchScalarGridSpec(
                num_scalar_prefetch=0, grid=grid,
                in_specs=[x_spec, w_spec], out_specs=o_spec),
            compiler_params=cparams, cost_estimate=cost,
        )(x2d, w_t)

    b2d = b.reshape(1, Cout)
    b_spec = pl.BlockSpec((1, tn), lambda i, j: (0, j))
    return pl.pallas_call(
        _linear_bias_kernel, out_shape=out_shape,
        grid_spec=pltpu.PrefetchScalarGridSpec(
            num_scalar_prefetch=0, grid=grid,
            in_specs=[x_spec, w_spec, b_spec], out_specs=o_spec),
        compiler_params=cparams, cost_estimate=cost,
    )(x2d, w_t, b2d)


# ----------------------------------------------------------------------------
# Flash-style attention kernel (online softmax over Nk tiles, G heads per step)
# ----------------------------------------------------------------------------

def _flash_attn_kernel(q_ref, k_ref, v_ref, o_ref, m_ref, l_ref, acc_ref, *,
                       G, D, nk_valid, tk):
    ki = pl.program_id(3)

    @pl.when(ki == 0)
    def _init():
        m_ref[...] = jnp.full(m_ref.shape, -jnp.inf, m_ref.dtype)
        l_ref[...] = jnp.zeros(l_ref.shape, l_ref.dtype)
        acc_ref[...] = jnp.zeros(acc_ref.shape, acc_ref.dtype)

    q = q_ref[0]                    # (tq, G*D) bf16 -> fed straight to the MXU
    k = k_ref[0]                    # (tk, G*D)
    v = v_ref[0]                    # (tk, G*D)

    needs_mask = (nk_valid % tk) != 0   # static: only when Nk has a partial tile
    if needs_mask:
        key_row = ki * tk + jax.lax.broadcasted_iota(jnp.int32, (1, tk), 1)
        key_ok_row = key_row < nk_valid                       # (1, tk)
        key_col = ki * tk + jax.lax.broadcasted_iota(jnp.int32, (tk, 1), 0)
        key_ok_col = key_col < nk_valid                       # (tk, 1)

    for h in range(G):              # static, small unrolled head loop
        sl = slice(h * D, (h + 1) * D)
        qh, kh, vh = q[:, sl], k[:, sl], v[:, sl]

        # q @ k^T without an explicit transpose (softmax scale already folded
        # into Wq in the projection).
        # TODO(synk): if the MLIR shows a per-step XLU transpose of kh, emit K
        # pre-transposed (B, GD, Nk) from the projection instead.
        s = jax.lax.dot_general(qh, kh, (((1,), (1,)), ((), ())),
                                preferred_element_type=jnp.float32)
        if needs_mask:
            # Large-finite mask (not -inf): keeps alpha finite even if a whole
            # tile were ever fully masked (relevant once a real mask path is
            # added; for mask=None the final partial tile always has >=1 key).
            s = jnp.where(key_ok_row, s, -1e30)
            # Out-of-range V rows are stale VMEM; zero them so 0 * garbage can
            # never inject Inf/NaN through the p @ v matmul.
            vh = jnp.where(key_ok_col, vh, jnp.zeros((), vh.dtype))

        m_prev = m_ref[h]                                     # (tq, 1)
        m_new = jnp.maximum(m_prev, jnp.max(s, axis=-1, keepdims=True))
        alpha = jnp.exp(m_prev - m_new)
        p = jnp.exp(s - m_new)                                # (tq, tk) f32
        l_ref[h] = alpha * l_ref[h] + jnp.sum(p, axis=-1, keepdims=True)
        acc_ref[h] = alpha * acc_ref[h] + jnp.dot(
            p.astype(vh.dtype), vh, preferred_element_type=jnp.float32)
        m_ref[h] = m_new

    @pl.when(ki == pl.num_programs(3) - 1)
    def _finalize():
        for h in range(G):
            l_h = l_ref[h]
            inv = pl.reciprocal(l_h, approx=True)    # EUP slot
            inv = inv * (2.0 - l_h * inv)            # one Newton step -> ~f32 exact
            # Per-head store straight into the output block (no concat temp).
            o_ref[0, :, h * D:(h + 1) * D] = (acc_ref[h] * inv).astype(o_ref.dtype)


def flash_attention(q_buf, k_buf, v_buf, *, heads, dim_head, group,
                    q_col=0, k_col=0, v_col=0, tq_target=512, tk_target=512):
    """q_buf: (B, Nq, Wq), k_buf/v_buf: (B, Nk, Wk/Wv); q/k/v live at column
    offsets q_col/k_col/v_col inside (possibly shared, packed) buffers with
    heads packed along channels.  Returns (B, Nq, heads*dim_head) packed.

    TODO(synk): pipeline_mode=pl.Buffered(3) on the k/v specs if the bundle
    dump ever shows exposed K/V DMA waits."""
    B, Nq, _ = q_buf.shape
    Nk = k_buf.shape[1]
    H, D, G = heads, dim_head, group
    assert H % G == 0
    GD = G * D
    inner = H * D
    assert q_col % GD == 0 and k_col % GD == 0 and v_col % GD == 0
    qb, kb, vb = q_col // GD, k_col // GD, v_col // GD

    tq = Nq if Nq <= tq_target else tq_target      # targets are 16-aligned
    tk = Nk if Nk <= tk_target else tk_target

    grid = (B, H // G, pl.cdiv(Nq, tq), pl.cdiv(Nk, tk))
    kernel = functools.partial(_flash_attn_kernel, G=G, D=D, nk_valid=Nk, tk=tk)

    isz = q_buf.dtype.itemsize
    n_q_tiles = pl.cdiv(Nq, tq)
    cost = pl.CostEstimate(
        flops=int(4 * B * H * Nq * Nk * D),
        transcendentals=int(B * H * Nq * Nk),
        bytes_accessed=int(isz * (2 * B * Nq * inner
                                  + 2 * B * Nk * inner * n_q_tiles)))
    ws = 2 * (2 * tq * GD + 2 * tk * GD) * isz + G * tq * (D + 256) * 4

    out = pl.pallas_call(
        kernel,
        out_shape=jax.ShapeDtypeStruct((B, Nq, inner), q_buf.dtype),
        grid_spec=pltpu.PrefetchScalarGridSpec(
            num_scalar_prefetch=0,
            grid=grid,
            in_specs=[
                pl.BlockSpec((1, tq, GD), lambda b, g, qi, ki: (b, qi, qb + g)),
                pl.BlockSpec((1, tk, GD), lambda b, g, qi, ki: (b, ki, kb + g)),
                pl.BlockSpec((1, tk, GD), lambda b, g, qi, ki: (b, ki, vb + g)),
            ],
            out_specs=pl.BlockSpec((1, tq, GD), lambda b, g, qi, ki: (b, qi, g)),
            scratch_shapes=[
                pltpu.VMEM((G, tq, 1), jnp.float32),   # running max per head
                pltpu.VMEM((G, tq, 1), jnp.float32),   # running denom per head
                pltpu.VMEM((G, tq, D), jnp.float32),   # output accumulator per head
            ],
        ),
        compiler_params=pltpu.CompilerParams(
            dimension_semantics=("parallel", "parallel", "parallel", "arbitrary"),
            vmem_limit_bytes=_maybe_vmem_limit(ws)),
        cost_estimate=cost,
    )(q_buf, k_buf, v_buf)
    return out


# ----------------------------------------------------------------------------
# Module: parameter init + forward
# ----------------------------------------------------------------------------

class MemoryEfficientCrossAttention:
    def __init__(self, query_dim, context_dim=None, heads=8, dim_head=64,
                 dropout=0.0, key=None, compute_dtype=jnp.bfloat16):
        if key is None:
            key = jax.random.PRNGKey(0)
        context_dim = query_dim if context_dim is None else context_dim
        inner_dim = heads * dim_head
        self.heads = heads
        self.dim_head = dim_head
        self.query_dim = query_dim
        self.context_dim = context_dim
        self.compute_dtype = compute_dtype

        kq, kk, kv, ko, kb = jax.random.split(key, 5)

        # nn.Linear default init: U(-1/sqrt(fan_in), 1/sqrt(fan_in)).
        def _w(k_, out_f, in_f):
            bound = 1.0 / math.sqrt(in_f)
            return jax.random.uniform(k_, (out_f, in_f), jnp.float32, -bound, bound)

        # f32 master weights (kept for the pure-f32 reference).
        self.w_q = _w(kq, inner_dim, query_dim)
        self.w_k = _w(kk, inner_dim, context_dim)
        self.w_v = _w(kv, inner_dim, context_dim)
        self.w_out = _w(ko, query_dim, inner_dim)
        bound = 1.0 / math.sqrt(inner_dim)
        self.b_out = jax.random.uniform(kb, (query_dim,), jnp.float32, -bound, bound)

        # Kernel weights: pre-transposed once, softmax scale folded into Wq,
        # cast to bf16 once (MXU runs at bf16 rate, DMA traffic halves).
        scale = 1.0 / math.sqrt(dim_head)
        cdt = compute_dtype
        self.w_q_t = (self.w_q.T * scale).astype(cdt)                          # (Cq, inner)
        self.w_kv_t = jnp.concatenate([self.w_k.T, self.w_v.T], axis=1).astype(cdt)  # (Cc, 2*inner)
        self.w_out_t = self.w_out.T.astype(cdt)                                # (inner, Cq)
        if context_dim == query_dim:
            self.w_qkv_t = jnp.concatenate(
                [self.w_q.T * scale, self.w_k.T, self.w_v.T], axis=1).astype(cdt)    # (Cq, 3*inner)
        else:
            self.w_qkv_t = None
        # dropout is identity at inference

    def __call__(self, x, context=None, mask=None):
        # TODO(synk): xformers-style mask preprocessing (77-token block mask +
        # extra zero key/value row) is not implemented; mask=None path only.
        assert mask is None
        b, n, _ = x.shape
        h, d = self.heads, self.dim_head
        inner = h * d
        G = _pick_head_group(h, d)
        packed_ok = (G * d) % 128 == 0   # lane-dense head groups -> consume packed buffers

        x2d = x.reshape(b * n, -1)
        if context is None and self.w_qkv_t is not None:
            qkv = linear(x2d, self.w_qkv_t)                      # (b*n, 3*inner) bf16, fused Q|K|V
            if packed_ok:
                buf = qkv.reshape(b, n, 3 * inner)
                q_buf = k_buf = v_buf = buf
                q_col, k_col, v_col = 0, inner, 2 * inner
            else:
                q_buf = qkv[:, :inner].reshape(b, n, inner)
                k_buf = qkv[:, inner:2 * inner].reshape(b, n, inner)
                v_buf = qkv[:, 2 * inner:].reshape(b, n, inner)
                q_col = k_col = v_col = 0
        else:
            context = x if context is None else context
            m = context.shape[1]
            c2d = context.reshape(b * m, -1)
            q = linear(x2d, self.w_q_t)                          # (b*n, inner)  (scale folded)
            kv = linear(c2d, self.w_kv_t)                        # (b*m, 2*inner) fused K|V
            q_buf = q.reshape(b, n, inner)
            q_col = 0
            if packed_ok:
                k_buf = v_buf = kv.reshape(b, m, 2 * inner)
                k_col, v_col = 0, inner
            else:
                k_buf = kv[:, :inner].reshape(b, m, inner)
                v_buf = kv[:, inner:].reshape(b, m, inner)
                k_col = v_col = 0

        # Heads stay packed along channels; the attention kernel selects head
        # groups via its BlockSpec/grid -> no split/merge transposes.
        out = flash_attention(q_buf, k_buf, v_buf, heads=h, dim_head=d, group=G,
                              q_col=q_col, k_col=k_col, v_col=v_col)  # (b, n, inner) bf16

        y = linear(out.reshape(b * n, inner), self.w_out_t, self.b_out,
                   out_dtype=x.dtype)
        return y.reshape(b, n, -1)


# ----------------------------------------------------------------------------
# References (for sanity checks)
# ----------------------------------------------------------------------------

def reference_forward_f32(mod, x, context=None):
    """Pure f32 math, identical to the PyTorch module."""
    context = x if context is None else context
    b, n, _ = x.shape
    h, d = mod.heads, mod.dim_head
    q = x @ mod.w_q.T
    k = context @ mod.w_k.T
    v = context @ mod.w_v.T

    def sh(t):
        return t.reshape(t.shape[0], t.shape[1], h, d).transpose(0, 2, 1, 3)

    q, k, v = sh(q), sh(k), sh(v)
    s = jnp.einsum("bhqd,bhkd->bhqk", q, k) / math.sqrt(d)
    p = jax.nn.softmax(s, axis=-1)
    o = jnp.einsum("bhqk,bhkd->bhqd", p, v)
    o = o.transpose(0, 2, 1, 3).reshape(b, n, h * d)
    return o @ mod.w_out.T + mod.b_out


def reference_quantized(mod, x, context=None):
    """Same bf16 quantization points as the kernels (matched reference)."""
    f32, cdt = jnp.float32, mod.compute_dtype
    b, n, _ = x.shape
    h, d = mod.heads, mod.dim_head
    inner = h * d
    x2 = x.reshape(b * n, -1).astype(cdt)
    if context is None and mod.w_qkv_t is not None:
        qkv = jnp.dot(x2, mod.w_qkv_t, preferred_element_type=f32).astype(cdt)
        q, k, v = qkv[:, :inner], qkv[:, inner:2 * inner], qkv[:, 2 * inner:]
        m = n
    else:
        ctx = x if context is None else context
        m = ctx.shape[1]
        c2 = ctx.reshape(b * m, -1).astype(cdt)
        q = jnp.dot(x2, mod.w_q_t, preferred_element_type=f32).astype(cdt)
        kv = jnp.dot(c2, mod.w_kv_t, preferred_element_type=f32).astype(cdt)
        k, v = kv[:, :inner], kv[:, inner:]
    q = q.reshape(b, n, h, d).transpose(0, 2, 1, 3)
    k = k.reshape(b, m, h, d).transpose(0, 2, 1, 3)
    v = v.reshape(b, m, h, d).transpose(0, 2, 1, 3)
    s = jnp.einsum("bhqd,bhkd->bhqk", q, k,
                   preferred_element_type=f32)       # scale already folded into Wq
    p = jax.nn.softmax(s, axis=-1)
    o = jnp.einsum("bhqk,bhkd->bhqd", p.astype(cdt), v,
                   preferred_element_type=f32).astype(cdt)
    o = o.transpose(0, 2, 1, 3).reshape(b * n, inner)
    out = jnp.dot(o, mod.w_out_t, preferred_element_type=f32) + mod.b_out
    return out.reshape(b, n, -1).astype(x.dtype)


if __name__ == "__main__":
    key = jax.random.PRNGKey(0)
    keys = jax.random.split(key, 8)

    def check(got, want, tol):
        assert got.shape == want.shape
        err = float(jnp.max(jnp.abs(got - want)))
        assert jnp.allclose(got, want, atol=tol, rtol=tol), err

    # --- small shapes; GD not lane-dense -> fallback (sliced q/k/v) path ---
    b, n_q, n_ctx = 2, 16, 8
    x = jax.random.normal(keys[0], (b, n_q, 32), jnp.float32)
    ctx = jax.random.normal(keys[1], (b, n_ctx, 32), jnp.float32)
    mod = MemoryEfficientCrossAttention(32, context_dim=32, heads=4, dim_head=8,
                                        key=keys[2])
    out = jax.block_until_ready(mod(x, context=ctx))
    check(out, reference_quantized(mod, x, context=ctx), 2e-2)
    check(out, reference_forward_f32(mod, x, context=ctx), 6e-2)
    out_self = jax.block_until_ready(mod(x))              # fused Q|K|V projection
    check(out_self, reference_quantized(mod, x), 2e-2)

    # --- context_dim != query_dim ---
    ctx2 = jax.random.normal(keys[3], (b, n_ctx, 48), jnp.float32)
    mod2 = MemoryEfficientCrossAttention(32, context_dim=48, heads=4, dim_head=8,
                                         key=keys[4])
    out2 = jax.block_until_ready(mod2(x, context=ctx2))
    check(out2, reference_quantized(mod2, x, context=ctx2), 2e-2)

    # --- realistic head dim: packed-buffer path, multi-tile M / Nq / Nk with
    #     partial (masked) boundary tiles on every axis ---
    b3, nq3, nk3 = 2, 600, 700
    x3 = jax.random.normal(keys[5], (b3, nq3, 64), jnp.float32)
    c3 = jax.random.normal(keys[6], (b3, nk3, 64), jnp.float32)
    mod3 = MemoryEfficientCrossAttention(64, context_dim=64, heads=2, dim_head=64,
                                         key=keys[7])
    out3 = jax.block_until_ready(mod3(x3, context=c3))     # packed K|V buffer
    check(out3, reference_quantized(mod3, x3, context=c3), 3e-2)
    out3s = jax.block_until_ready(mod3(x3))                # packed fused Q|K|V buffer
    check(out3s, reference_quantized(mod3, x3), 3e-2)

    print("KERNEL_OK")
</pallas_src>

<mosaic_0001>
module attributes {stable_mosaic.version = 11 : i64} {
  func.func @_linear_kernel(%arg0: i32, %arg1: i32, %arg2: memref<32x32xf32, #tpu.memory_space<vmem>>, %arg3: memref<32x32xbf16, #tpu.memory_space<vmem>>, %arg4: memref<32x32xbf16, #tpu.memory_space<vmem>>) attributes {dimension_semantics = [#tpu.dimension_semantics<parallel>, #tpu.dimension_semantics<parallel>], iteration_bounds = array<i64: 1, 1>, scalar_prefetch = 0 : i64, scratch_operands = 0 : i64, tpu.core_type = #tpu.core_type<tc>, window_params = [{transform_indices = @transform_0, window_bounds = array<i64: 32, 32>}, {transform_indices = @transform_1, window_bounds = array<i64: 32, 32>}, {transform_indices = @transform_2, window_bounds = array<i64: 32, 32>}]} {
    %c0 = arith.constant 0 : index
    %c0_0 = arith.constant 0 : index
    %0 = vector.load %arg2[%c0, %c0_0] : memref<32x32xf32, #tpu.memory_space<vmem>>, vector<32x32xf32>
    %1 = arith.truncf %0 : vector<32x32xf32> to vector<32x32xbf16>
    %c0_1 = arith.constant 0 : index
    %c0_2 = arith.constant 0 : index
    %2 = vector.load %arg3[%c0_1, %c0_2] : memref<32x32xbf16, #tpu.memory_space<vmem>>, vector<32x32xbf16>
    %cst = arith.constant dense<0.000000e+00> : vector<32x32xf32>
    %3 = tpu.matmul %1, %2, %cst {dimension_numbers = #tpu.dot_dimension_numbers<[1], [0], [0], [1], [0, 0, 1, 1], [], []>} : vector<32x32xbf16>, vector<32x32xbf16>, vector<32x32xf32> -> vector<32x32xf32>
    %4 = arith.truncf %3 : vector<32x32xf32> to vector<32x32xbf16>
    %c0_3 = arith.constant 0 : index
    %c0_4 = arith.constant 0 : index
    %5 = vector.load %arg4[%c0_3, %c0_4] : memref<32x32xbf16, #tpu.memory_space<vmem>>, vector<32x32xbf16>
    tpu.vector_store %arg4[%c0_3, %c0_4], %4 {strides = array<i32>} : memref<32x32xbf16, #tpu.memory_space<vmem>>, vector<32x32xbf16>,
    return
  }
  func.func @transform_0(%arg0: i32, %arg1: i32) -> (i32, i32) {
    %c0_i32 = arith.constant 0 : i32
    %c0_i32_0 = arith.constant 0 : i32
    return %arg0, %c0_i32 : i32, i32
  }
  func.func @transform_1(%arg0: i32, %arg1: i32) -> (i32, i32) {
    %c0_i32 = arith.constant 0 : i32
    %c0_i32_0 = arith.constant 0 : i32
    return %c0_i32, %arg1 : i32, i32
  }
  func.func @transform_2(%arg0: i32, %arg1: i32) -> (i32, i32) {
    %c0_i32 = arith.constant 0 : i32
    return %arg0, %arg1 : i32, i32
  }
}

</mosaic_0001>

<bundles_post_ra>
// kernel: tpu_custom_call.1
= control target key start
LH: loop header
LB: loop body
LE: loop exit
PB: predicated region body
PF: predicated region fallthrough
CT: control target
= control target key end

     0   :  { %7 = vsyncpa [#allocation3], 0  ;;  %s262_s0 = inlined_call_operand.hbm [shape: f32[32,32], index: 0, kind: input, shape index: {}]   ;;  %s263_s1 = inlined_call_operand.hbm [shape: bf16[32,32], index: 1, kind: input, shape index: {}]   ;;  %s264_s2 = inlined_call_operand.hbm [shape: bf16[32,32], index: 2, kind: output, shape index: {}]  }
   0x1   :  { %8 = vsyncpa [#allocation6], 0 }
   0x2   :  { %9 = vsyncpa [#allocation4], 0  ;;  %s14_s11 = sshll.u32 %s262_s0, 4  ;;  %s221_s12 = smov [#allocation2]   ;;  %s15_s11 = int_to_ptr.hbm [resolvable:$true] %s14_s11 }
   0x3   :  { %s16_s13 = sshll.u32 %s221_s12, 4  ;;  %s27_s16 = sshll.u32 %s263_s1, 4  ;;  %s17_s13 = int_to_ptr.vmem [resolvable:$true] %s16_s13  ;;  %s28_s16 = int_to_ptr.hbm [resolvable:$true] %s27_s16 }
   0x4   :  { %s222_s17 = smov 128   ;;  %s223_s18 = smov 8  }
   0x5   :  { %22 = dma.hbm_to_vmem [thread:$0]  %s15_s11, 512, %s17_s13, [#allocation3], %s222_s17, %s222_s17, %s223_s18  }
   0x6   :  { %s224_s19 = smov [#allocation5]   ;;  %s225_s21 = smov 64  }
   0x7   :  { %s29_s20 = sshll.u32 %s224_s19, 4  ;;  %s226_s22 = smov 4   ;;  %s30_s20 = int_to_ptr.vmem [resolvable:$true] %s29_s20 }
   0x8   :  { %35 = dma.hbm_to_vmem [thread:$0]  %s28_s16, 256, %s30_s20, [#allocation6], %s225_s21, %s225_s21, %s226_s22  }
   0x9   :  { %215 = dma.done.wait [#allocation3], 512  }
   0xa   :  { %216 = vsyncadd [#allocation3], 4294966784 }
   0xb   :  { %217 = dma.done.wait [#allocation6], 256  }
   0xc   :  { %218 = vsyncadd [#allocation6], 4294967040  ;;  %v133_v0 = vld [vmem:[#allocation5 + $0x8] sm:$0xff]  ;;  %v132_v1 = vld [vmem:[#allocation5] sm:$0xff]  ;;  %vm67_vm0 = vcmask 261120   ;;  %vm97_vm1 = vcmask 257024  }
   0xd   :  { %v45_v2 = vld [vmem:[#allocation2] sm:$0xff]  ;;  %80 = vmatpush.bf16.msra.mxu0 %v133_v0  ;;  %134 = vmatpush.bf16.msra.mxu1 %v133_v0  ;;  %v46_v3 = vld [vmem:[#allocation2 + $0x8] sm:$0xff]  ;;  %v47_v4 = vld [vmem:[#allocation2 + $0x10] sm:$0xff]  ;;  %s227_s0 = smov [#allocation7]   ;;  %s108_s25 = sshll.u32 %s264_s2, 4  ;;  %s109_s25 = int_to_ptr.hbm [resolvable:$true] %s108_s25 }
   0xe   :  { %v48_v5 = vld [vmem:[#allocation2 + $0x18] sm:$0xff]  ;;  %v49_v6 = vpack.c.bf16 %v46_v3, %v45_v2  ;;  %s106_s1 = sshll.u32 %s227_s0, 4  ;;  %s107_s1 = int_to_ptr.vmem [resolvable:$true] %s106_s1 }
   0xf   :  { %v50_v7 = vpack.c.bf16 %v48_v5, %v47_v4 }
  0x11   :  { %81 = vmatpush.bf16.msra.mxu0 %v132_v1  ;;  %135 = vmatpush.bf16.msra.mxu1 %v132_v1 }
  0x14   :  { %130 = vmatmul.msk.bf16.vlgmr.msra.gmra.mxu0 %vm67_vm0, %v49_v6  ;;  %131 = vmatmul.msk.bf16.vlgmr.msra.gmra.mxu1 %vm67_vm0, %v50_v7 }
  0x91   :  { %v83_v8 = vpop.f32.mrf.mxu0  ;;  %v88_v9 = vpop.f32.mrf.mxu1 }
  0x92   :  { %v93_v10 = vpack.c.bf16 %v83_v8, %v83_v8  ;;  %v95_v11 = vpack.c.bf16 %v88_v9, %v88_v9 }
  0x94   :  { %98 = vst.msk [vmem:[#allocation7] sm:$0xf] %vm97_vm1, %v93_v10 }
  0x95   :  { %100 = vst.msk [vmem:[#allocation7 + $0x8] sm:$0xf] %vm97_vm1, %v95_v11 }
  0x99   :  { %v85_v12 = vpop.f32.mrf.mxu0  ;;  %v90_v13 = vpop.f32.mrf.mxu1 }
  0x9a   :  { %v94_v14 = vpack.c.bf16 %v85_v12, %v85_v12  ;;  %v96_v15 = vpack.c.bf16 %v90_v13, %v90_v13 }
  0x9c   :  { %99 = vst.msk [vmem:[#allocation7 + $0x4] sm:$0xf] %vm97_vm1, %v94_v14 }
  0x9d   :  { %101 = vst.msk [vmem:[#allocation7 + $0xc] sm:$0xf] %vm97_vm1, %v96_v15 }
  0x9e   :  { %114 = dma.vmem_to_hbm [thread:$0]  %s107_s1, 256, %s109_s25, [#allocation4], %s225_s21, %s225_s21, %s226_s22  }
  0x9f   :  { %219 = dma.done.wait [#allocation4], 256  }
  0xa0   :  { %220 = vsyncadd [#allocation4], 4294967040 }
  0xa1   :  { %119 = vsyncpa [#allocation3], 1 }
  0xa2   :  { %120 = vsyncpa [#allocation6], 1 }
  0xa3   :  { %121 = vsyncpa [#allocation4], 1 }

</bundles_post_ra>
